<compile_context>
chip_gen: v7x
topology: tpu7x:2x2x1
jax: 0.10.0
libtpu: 0.0.40
codegen_flags: <defaults>
</compile_context>

<pallas_src>
import functools

import jax
import jax.numpy as jnp
from jax import lax
from jax.experimental import pallas as pl
from jax.experimental.pallas import tpu as pltpu

_LANES = 128              # fused heads are padded to this so the split is lane-aligned
_MIN_TILE_B = 256
_MAX_TILE_B = 1024
_VMEM_BUDGET = 12 << 20   # stay under the 16 MiB default scoped VMEM on v5e


def _round_up(n, m):
    return ((n + m - 1) // m) * m


def _pad_cols(a, target_cols):
    pad = target_cols - a.shape[-1]
    if pad == 0:
        return a
    return jnp.pad(a, [(0, 0)] * (a.ndim - 1) + [(0, pad)])


def _choose_tile_b(feat_itemsize, F, w_cols, out_cols, param_itemsize):
    """Largest row tile (multiple of 256, <=1024) whose double-buffered
    feat/out tiles + grid-invariant weights fit a conservative VMEM budget."""
    weight_bytes = 2 * (F + 1) * w_cols * param_itemsize   # w + bias, double-buffered
    row_bytes = (F + out_cols) * feat_itemsize             # feat row + output row(s)
    avail = max(_VMEM_BUDGET - weight_bytes, 2 << 20)
    tile = avail // (2 * row_bytes)                        # double-buffered
    tile = (tile // _MIN_TILE_B) * _MIN_TILE_B
    return int(max(_MIN_TILE_B, min(_MAX_TILE_B, tile)))


# ---------------------------------------------------------------------------
# Kernels
# ---------------------------------------------------------------------------
def _linear_kernel(feat_ref, w_ref, b_ref, out_ref, *, normalize):
    """y = feat @ w + b, optionally L2-normalized over the last dim.

    Output is stored narrow (nz_rot columns) -- no padded output pass."""
    x = feat_ref[...]
    w = w_ref[...]
    b = b_ref[...].astype(jnp.float32)
    y = jnp.dot(x, w, preferred_element_type=jnp.float32) + b
    if normalize:
        # torch F.normalize(eps=1e-12): x / max(||x||, 1e-12)
        #   == x * rsqrt(max(sumsq, 1e-24))     (rsqrt -> EUP slot)
        sumsq = jnp.sum(y * y, axis=-1, keepdims=True)
        y = y * lax.rsqrt(jnp.maximum(sumsq, 1e-24))
    out_ref[...] = y.astype(out_ref.dtype)


def _fused_var_kernel(feat_ref, w_ref, b_ref, quat_ref, logvar_ref, *, rp, nz_rot):
    """Fused pred_layer + var_layer: one matmul over concatenated weights.

    Weights are (F, 2*rp) with each head zero-padded to rp (lane-aligned split);
    outputs are stored narrow (nz_rot columns each)."""
    x = feat_ref[...]
    w = w_ref[...]
    b = b_ref[...].astype(jnp.float32)
    y = jnp.dot(x, w, preferred_element_type=jnp.float32) + b
    quat_ref[...] = y[:, :nz_rot].astype(quat_ref.dtype)
    # relu(v + 6.9) - 6.9  ==  max(v, -6.9)
    logvar_ref[...] = jnp.maximum(y[:, rp:rp + nz_rot], -6.9).astype(logvar_ref.dtype)


# ---------------------------------------------------------------------------
# pallas_call wrappers
# ---------------------------------------------------------------------------
def _pallas_linear(feat, w, b, *, normalize=False):
    B, F = feat.shape
    n_out = w.shape[1]
    kernel = functools.partial(_linear_kernel, normalize=normalize)
    out_shape = jax.ShapeDtypeStruct((B, n_out), feat.dtype)

    tile_b = _choose_tile_b(feat.dtype.itemsize, F, n_out, n_out, w.dtype.itemsize)
    if B > tile_b:
        return pl.pallas_call(
            kernel,
            out_shape=out_shape,
            grid=(pl.cdiv(B, tile_b),),          # ragged tail handled by Pallas
            in_specs=[
                pl.BlockSpec((tile_b, F), lambda i: (i, 0)),
                pl.BlockSpec((F, n_out), lambda i: (0, 0)),   # grid-invariant
                pl.BlockSpec((1, n_out), lambda i: (0, 0)),   # grid-invariant
            ],
            out_specs=pl.BlockSpec((tile_b, n_out), lambda i: (i, 0)),
            compiler_params=pltpu.CompilerParams(
                dimension_semantics=("parallel",)),
        )(feat, w, b)
    # Small batch: single no-grid call, whole arrays resident in VMEM.
    return pl.pallas_call(kernel, out_shape=out_shape)(feat, w, b)


def _pallas_fused_var(feat, w_fused, b_fused, nz_rot, rp):
    B, F = feat.shape
    w_cols = w_fused.shape[1]                    # 2 * rp
    kernel = functools.partial(_fused_var_kernel, rp=rp, nz_rot=nz_rot)
    out_shapes = (jax.ShapeDtypeStruct((B, nz_rot), feat.dtype),
                  jax.ShapeDtypeStruct((B, nz_rot), feat.dtype))

    tile_b = _choose_tile_b(feat.dtype.itemsize, F, w_cols, 2 * nz_rot,
                            w_fused.dtype.itemsize)
    if B > tile_b:
        return pl.pallas_call(
            kernel,
            out_shape=out_shapes,
            grid=(pl.cdiv(B, tile_b),),
            in_specs=[
                pl.BlockSpec((tile_b, F), lambda i: (i, 0)),
                pl.BlockSpec((F, w_cols), lambda i: (0, 0)),
                pl.BlockSpec((1, w_cols), lambda i: (0, 0)),
            ],
            out_specs=(pl.BlockSpec((tile_b, nz_rot), lambda i: (i, 0)),
                       pl.BlockSpec((tile_b, nz_rot), lambda i: (i, 0))),
            compiler_params=pltpu.CompilerParams(
                dimension_semantics=("parallel",)),
        )(feat, w_fused, b_fused)
    return pl.pallas_call(kernel, out_shape=out_shapes)(feat, w_fused, b_fused)


# ---------------------------------------------------------------------------
# Module
# ---------------------------------------------------------------------------
class QuatPredictor:
    """JAX/Pallas port of the PyTorch QuatPredictor module."""

    def __init__(self, nz_feat, nz_rot, classify_rot=True, var_gmm_rot=False,
                 param_dtype=jnp.float32, key=jax.random.PRNGKey(0)):
        self.classify_rot = classify_rot
        self.var_gmm_rot = var_gmm_rot
        self.nz_rot = nz_rot
        self._rp = _round_up(nz_rot, _LANES)

        # PyTorch nn.Linear default init: U(-1/sqrt(fan_in), 1/sqrt(fan_in)).
        bound = 1.0 / (nz_feat ** 0.5)
        k1, k2, k3, k4 = jax.random.split(key, 4)

        # Reference parameters (f32), stored transposed: (nz_feat, nz_rot).
        self.pred_w_t = jax.random.uniform(
            k1, (nz_feat, nz_rot), jnp.float32, -bound, bound)
        self.pred_b = jax.random.uniform(
            k2, (1, nz_rot), jnp.float32, -bound, bound)

        if self.var_gmm_rot:
            self.var_w_t = jax.random.uniform(
                k3, (nz_feat, nz_rot), jnp.float32, -bound, bound)
            self.var_b = jax.random.uniform(
                k4, (1, nz_rot), jnp.float32, -bound, bound)
            # Fused [pred | var] weight/bias, each head zero-padded to rp lanes
            # so the in-kernel split is lane-aligned.  Only the WEIGHTS carry
            # padding (loaded once); kernel outputs stay narrow.
            self._w_fused = jnp.concatenate(
                [_pad_cols(self.pred_w_t, self._rp),
                 _pad_cols(self.var_w_t, self._rp)], axis=1).astype(param_dtype)
            self._b_fused = jnp.concatenate(
                [_pad_cols(self.pred_b, self._rp),
                 _pad_cols(self.var_b, self._rp)], axis=1).astype(param_dtype)
        else:
            # No padding needed: kernel stores the narrow nz_rot output directly.
            self._w = self.pred_w_t.astype(param_dtype)
            self._b = self.pred_b.astype(param_dtype)

    def __call__(self, feat):
        # Note: outputs are cast to feat.dtype; pass bf16 feat for halved input
        # HBM traffic (MXU still accumulates in f32 inside the kernel).
        if self.var_gmm_rot:
            return _pallas_fused_var(
                feat, self._w_fused, self._b_fused, self.nz_rot, self._rp)
        elif self.classify_rot:
            return _pallas_linear(feat, self._w, self._b)
        else:
            return _pallas_linear(feat, self._w, self._b, normalize=True)


if __name__ == "__main__":
    B, NZ_FEAT, NZ_ROT = 8, 32, 48
    key = jax.random.PRNGKey(0)
    feat = jax.random.normal(key, (B, NZ_FEAT), jnp.float32)

    # 1) Default mode: classify_rot=True (pure linear), small-batch path.
    mod = QuatPredictor(NZ_FEAT, NZ_ROT, classify_rot=True, var_gmm_rot=False)
    quat = mod(feat)
    jax.block_until_ready(quat)
    ref = feat @ mod.pred_w_t + mod.pred_b
    assert quat.shape == (B, NZ_ROT)
    assert jnp.allclose(quat, ref, atol=1e-5, rtol=1e-4)

    # 2) classify_rot=False: L2-normalized output (quaternion, nz_rot=4).
    mod_n = QuatPredictor(NZ_FEAT, 4, classify_rot=False, var_gmm_rot=False)
    quat_n = mod_n(feat)
    jax.block_until_ready(quat_n)
    y = feat @ mod_n.pred_w_t + mod_n.pred_b
    ref_n = y / jnp.maximum(
        jnp.sqrt(jnp.sum(y * y, axis=-1, keepdims=True)), 1e-12)
    assert jnp.allclose(quat_n, ref_n, atol=1e-5, rtol=1e-4)

    # 3) var_gmm_rot: fused single kernel -> (quat, log_variance).
    mod_v = QuatPredictor(NZ_FEAT, NZ_ROT, var_gmm_rot=True)
    quat_v, log_var = mod_v(feat)
    jax.block_until_ready((quat_v, log_var))
    ref_q = feat @ mod_v.pred_w_t + mod_v.pred_b
    ref_lv = jnp.maximum(feat @ mod_v.var_w_t + mod_v.var_b + 6.9, 0.0) - 6.9
    assert jnp.allclose(quat_v, ref_q, atol=1e-5, rtol=1e-4)
    assert jnp.allclose(log_var, ref_lv, atol=1e-5, rtol=1e-4)

    # 4) Large ragged batch (not a multiple of the row tile) exercises the
    #    general tiled grid path for both the single-head and fused kernels.
    B_BIG = 1100
    feat_big = jax.random.normal(jax.random.PRNGKey(1),
                                 (B_BIG, NZ_FEAT), jnp.float32)
    quat_big = mod(feat_big)
    jax.block_until_ready(quat_big)
    ref_big = feat_big @ mod.pred_w_t + mod.pred_b
    assert quat_big.shape == (B_BIG, NZ_ROT)
    assert jnp.allclose(quat_big, ref_big, atol=1e-5, rtol=1e-4)

    quat_vb, logvar_vb = mod_v(feat_big)
    jax.block_until_ready((quat_vb, logvar_vb))
    ref_qb = feat_big @ mod_v.pred_w_t + mod_v.pred_b
    ref_lvb = jnp.maximum(feat_big @ mod_v.var_w_t + mod_v.var_b + 6.9, 0.0) - 6.9
    assert jnp.allclose(quat_vb, ref_qb, atol=1e-5, rtol=1e-4)
    assert jnp.allclose(logvar_vb, ref_lvb, atol=1e-5, rtol=1e-4)

    print("KERNEL_OK")
</pallas_src>

<mosaic_0001>
module attributes {stable_mosaic.version = 11 : i64} {
  func.func @_linear_kernel(%arg0: memref<8x32xf32, #tpu.memory_space<vmem>>, %arg1: memref<32x48xf32, #tpu.memory_space<vmem>>, %arg2: memref<1x48xf32, #tpu.memory_space<vmem>>, %arg3: memref<8x48xf32, #tpu.memory_space<vmem>>) attributes {dimension_semantics = [], scalar_prefetch = 0 : i64, scratch_operands = 0 : i64, tpu.core_type = #tpu.core_type<tc>} {
    %c0 = arith.constant 0 : index
    %c0_0 = arith.constant 0 : index
    %0 = vector.load %arg0[%c0, %c0_0] : memref<8x32xf32, #tpu.memory_space<vmem>>, vector<8x32xf32>
    %c0_1 = arith.constant 0 : index
    %c0_2 = arith.constant 0 : index
    %1 = vector.load %arg1[%c0_1, %c0_2] : memref<32x48xf32, #tpu.memory_space<vmem>>, vector<32x48xf32>
    %c0_3 = arith.constant 0 : index
    %c0_4 = arith.constant 0 : index
    %2 = vector.load %arg2[%c0_3, %c0_4] : memref<1x48xf32, #tpu.memory_space<vmem>>, vector<1x48xf32>
    %cst = arith.constant dense<0.000000e+00> : vector<8x48xf32>
    %3 = tpu.matmul %0, %1, %cst {dimension_numbers = #tpu.dot_dimension_numbers<[1], [0], [0], [1], [0, 0, 1, 1], [], []>} : vector<8x32xf32>, vector<32x48xf32>, vector<8x48xf32> -> vector<8x48xf32>
    %4 = vector.broadcast %2 : vector<1x48xf32> to vector<8x48xf32>
    %5 = arith.addf %3, %4 : vector<8x48xf32>
    %c0_5 = arith.constant 0 : index
    %c0_6 = arith.constant 0 : index
    %6 = vector.load %arg3[%c0_5, %c0_6] : memref<8x48xf32, #tpu.memory_space<vmem>>, vector<8x48xf32>
    tpu.vector_store %arg3[%c0_5, %c0_6], %5 {strides = array<i32>} : memref<8x48xf32, #tpu.memory_space<vmem>>, vector<8x48xf32>,
    return
  }
}

</mosaic_0001>

<bundles_post_ra>
// kernel: tpu_custom_call.1
= control target key start
LH: loop header
LB: loop body
LE: loop exit
PB: predicated region body
PF: predicated region fallthrough
CT: control target
= control target key end

     0   :  { %8 = vsyncpa [#allocation3], 0  ;;  %s323_s0 = inlined_call_operand.hbm [shape: f32[8,32], index: 0, kind: input, shape index: {}]   ;;  %s324_s1 = inlined_call_operand.hbm [shape: f32[32,48], index: 1, kind: input, shape index: {}]   ;;  %s325_s2 = inlined_call_operand.vmem [shape: f32[1,48], index: 2, kind: input, shape index: {}]   ;;  %s326_s3 = inlined_call_operand.hbm [shape: f32[8,48], index: 3, kind: output, shape index: {}]  }
   0x1   :  { %9 = vsyncpa [#allocation6], 0 }
   0x2   :  { %10 = vsyncpa [#allocation4], 0  ;;  %s249_s12 = smov [#allocation2]   ;;  %s250_s14 = smov [#allocation5]  }
   0x3   :  { %s17_s13 = sshll.u32 %s249_s12, 4  ;;  %s26_s15 = sshll.u32 %s250_s14, 4  ;;  %s18_s13 = int_to_ptr.vmem [resolvable:$true] %s17_s13  ;;  %s277_s15 = int_to_ptr.vmem [resolvable:$true] %s26_s15 }
   0x4   :  { %s177_s18 = scalar_lea.hbm %s323_s0, 128 }
   0x5   :  { %p178_p0 = scmp.ne.s32.totalorder %s323_s0, %s177_s18  ;;  %p181_p1 = scmp.lt.u32.totalorder %s177_s18, %s323_s0 }
   0x7   :  { %p183_p2 = pnand %p181_p1, %p178_p0 }
   0x9   :  { %186 = shalt.err (!%p183_p2)
}
   0xa   :  { %s187_s23 = scalar_lea.vmem %s18_s13, 128  ;;  %p192_p4 = scmp.lt.s32.totalorder %s18_s13, %s18_s13 }
   0xb   :  { %p188_p3 = scmp.ne.s32.totalorder %s18_s13, %s187_s23  ;;  %p193_p5 = scmp.lt.s32.totalorder %s187_s23, %s187_s23 }
   0xd   :  { %p194_p6 = por %p193_p5, %p192_p4 }
   0xf   :  { %p195_p7 = pnand %p194_p6, %p188_p3 }
  0x11   :  { %198 = shalt.err (!%p195_p7)
}
  0x12   :  { %20 = dma.hbm_to_vmem [thread:$0]  %s323_s0, 128, %s18_s13, [#allocation3]  }
  0x13   :  { %s199_s28 = scalar_lea.hbm %s324_s1, 512 }
  0x14   :  { %p200_p8 = scmp.ne.s32.totalorder %s324_s1, %s199_s28  ;;  %p203_p9 = scmp.lt.u32.totalorder %s199_s28, %s324_s1 }
  0x16   :  { %p205_p10 = pnand %p203_p9, %p200_p8 }
  0x18   :  { %208 = shalt.err (!%p205_p10)
}
  0x19   :  { %s209_s6 = scalar_lea.vmem %s277_s15, 512  ;;  %p214_p12 = scmp.lt.s32.totalorder %s277_s15, %s277_s15 }
  0x1a   :  { %p210_p11 = scmp.ne.s32.totalorder %s277_s15, %s209_s6  ;;  %p215_p13 = scmp.lt.s32.totalorder %s209_s6, %s209_s6 }
  0x1c   :  { %p216_p0 = por %p215_p13, %p214_p12 }
  0x1e   :  { %p217_p1 = pnand %p216_p0, %p210_p11 }
  0x20   :  { %220 = shalt.err (!%p217_p1)
}
  0x21   :  { %s251_s0 = smov 128   ;;  %s252_s7 = smov 8  }
  0x22   :  { %32 = dma.hbm_to_vmem [thread:$0]  %s324_s1, 512, %s277_s15, [#allocation6], %s251_s0, %s251_s0, %s252_s7  }
  0x23   :  { %243 = dma.done.wait [#allocation3], 128  }
  0x24   :  { %244 = vsyncadd [#allocation3], 4294967168 }
  0x25   :  { %245 = dma.done.wait [#allocation6], 512  }
  0x26   :  { %246 = vsyncadd [#allocation6], 4294966784  ;;  %v253_v0 = vmov 0.0|0.0   ;;  %vm254_vm0 = vmmov 0   ;;  %v255_v1 = vmov 0.0   ;;  %v42_v2 = vld [vmem:[#allocation5] sm:$0xff] }
  0x27   :  { %163 = vmatprep.subr.bf16.mxu0 %v253_v0  ;;  %160 = vmatprep.mubr.msk.f32.mxu0 %vm254_vm0, %v255_v1  ;;  %v43_v3 = vld [vmem:[#allocation5 + $0x8] sm:$0xff]  ;;  %v44_v4 = vld [vmem:[#allocation5 + $0x10] sm:$0xff]  ;;  %v45_v6 = vld [vmem:[#allocation5 + $0x18] sm:$0xff]  ;;  %vm53_vm1 = vcmask 261120   ;;  %s256_s11 = smov [#allocation7]   ;;  %vm127_vm2 = vcmask 392192  }
  0x28   :  { %v164_v5 = vpack.c.bf16 %v43_v3, %v42_v2  ;;  %v167_v7 = vpack.c.bf16 %v45_v6, %v44_v4  ;;  %v41_v8 = vld [vmem:[#allocation2] sm:$0xff]  ;;  %s135_s12 = sshll.u32 %s256_s11, 4  ;;  %s136_s12 = int_to_ptr.vmem [resolvable:$true] %s135_s12 }
  0x29   :  { %v145_v9 = vld [vmem:[%s325_s2] ss:$0 sm:$0xff]  ;;  %s221_s13 = scalar_lea.vmem %s136_s12, 128  ;;  %p226_p3 = scmp.lt.s32.totalorder %s136_s12, %s136_s12 }
  0x2a   :  { %165 = vmatpush3.bf16.msra.mxu0 %v164_v5  ;;  %p222_p2 = scmp.ne.s32.totalorder %s136_s12, %s221_s13  ;;  %p227_p4 = scmp.lt.s32.totalorder %s221_s13, %s221_s13 }
  0x2b   :  { %166 = vmatprep.subr.bf16.mxu0 %v253_v0 }
  0x2c   :  { %p228_p5 = por %p227_p4, %p226_p3 }
  0x2e   :  { %168 = vmatpush3.bf16.msra.mxu0 %v167_v7  ;;  %p229_p6 = pnand %p228_p5, %p222_p2 }
  0x31   :  { %161 = vmatmul.mubr.msk.f32.vlgmr.msra.gmra.mrb[0].mxu0 %vm53_vm1, %v41_v8 }
 0x104   :  { %v123_v10 = vpop.f32.mrb[0].mxu0 }
 0x105   :  { %v124_v11 = vadd.f32 %v145_v9, %v123_v10  ;;  %v162_v12 = vpop.f32.mrb[1].mxu0 }
 0x107   :  { %128 = vst.msk [vmem:[#allocation7] sm:$0xff] %vm127_vm2, %v124_v11 }
 0x108   :  { %232 = shalt.err (!%p229_p6)
}
 0x109   :  { %s233_s16 = scalar_lea.hbm %s326_s3, 128 }
 0x10a   :  { %p234_p7 = scmp.ne.s32.totalorder %s326_s3, %s233_s16  ;;  %p237_p8 = scmp.lt.u32.totalorder %s233_s16, %s326_s3 }
 0x10c   :  { %p239_p9 = pnand %p237_p8, %p234_p7 }
 0x10e   :  { %242 = shalt.err (!%p239_p9)
}
 0x10f   :  { %138 = dma.vmem_to_hbm [thread:$0]  %s136_s12, 128, %s326_s3, [#allocation4]  }
 0x110   :  { %247 = dma.done.wait [#allocation4], 128  }
 0x111   :  { %248 = vsyncadd [#allocation4], 4294967168 }
 0x112   :  { %142 = vsyncpa [#allocation3], 1 }
 0x113   :  { %143 = vsyncpa [#allocation6], 1 }
 0x114   :  { %144 = vsyncpa [#allocation4], 1 }

</bundles_post_ra>
